<compile_context>
chip_gen: v5e
topology: v5e:2x2
jax: 0.10.0
libtpu: 0.0.40
codegen_flags: <defaults>
</compile_context>

<pallas_src>
import functools

import jax
import jax.numpy as jnp
from jax import lax
from jax.experimental import pallas as pl
from jax.experimental.pallas import tpu as pltpu


def _round_up(n, m):
    return ((n + m - 1) // m) * m


def _rnn_classifier_kernel(x_ref, wih_ref, whh_ref, bias_ref, wd_ref, bd_ref,
                           out_ref, xw_ref, *, seq_len, batch):
    """Single-invocation kernel (no grid): everything resident in VMEM.

    x_ref   : (T*B, Ipad)  bf16   flattened input sequence (lane-padded I)
    wih_ref : (Ipad, H)    bf16   W_ih^T (zero-padded contracting rows)
    whh_ref : (H, H)       bf16   W_hh^T
    bias_ref: (1, H)       f32    b_ih + b_hh
    wd_ref  : (H, Cpad)    bf16   W_dense^T (zero-padded class columns)
    bd_ref  : (1, Cpad)    f32    dense bias (zero-padded)
    out_ref : (B, Cpad)    f32    padded logits
    xw_ref  : (T*B, H)     f32    scratch: hoisted input projection + bias
    """
    # --- Hoisted input projection: one MXU matmul with M = T*B, bias folded in.
    xw_ref[...] = (
        jnp.dot(x_ref[...], wih_ref[...], preferred_element_type=jnp.float32)
        + bias_ref[...]
    )

    # Keep W_hh resident in vregs across the whole recurrence.
    whh = whh_ref[...]

    # --- Serial recurrence.  h lives in vregs (loop carry), loop fully
    # unrolled so the LLO scheduler can overlap adjacent steps.
    def step(t, h):
        row = pl.multiple_of(t * batch, batch)
        xw_t = xw_ref[pl.ds(row, batch), :]                      # (B, H) f32
        pre = xw_t + jnp.dot(h.astype(whh.dtype), whh,
                             preferred_element_type=jnp.float32)
        return jnp.maximum(pre, 0.0)                             # relu

    h0 = jnp.zeros((batch, whh_ref.shape[0]), jnp.float32)
    h = lax.fori_loop(0, seq_len, step, h0, unroll=True)

    # --- Dense classifier head on the final hidden state (lane-dense store).
    out_ref[...] = (
        jnp.dot(h.astype(wd_ref.dtype), wd_ref[...],
                preferred_element_type=jnp.float32)
        + bd_ref[...]
    )


@functools.partial(jax.jit, static_argnames=("classes",))
def rnn_classifier_forward(x, w_ih, w_hh, b_ih, b_hh, w_dense, b_dense,
                           classes=10):
    """x: (T, B, I) float32.  Weights follow PyTorch shapes:
       w_ih (H, I), w_hh (H, H), b_ih (H,), b_hh (H,),
       w_dense (C, H), b_dense (C,).
    Returns logits (B, C) float32.
    """
    seq_len, batch, input_size = x.shape
    hidden = w_hh.shape[0]
    ipad = _round_up(input_size, 128)
    cpad = _round_up(classes, 128)

    # Weight / input prep: transpose for row-major matmuls, zero-pad lane dims,
    # cast MXU operands to bf16 (accumulation stays f32 inside the kernel).
    wih_t = jnp.pad(jnp.transpose(w_ih),
                    ((0, ipad - input_size), (0, 0))).astype(jnp.bfloat16)
    whh_t = jnp.transpose(w_hh).astype(jnp.bfloat16)
    wd_t = jnp.pad(jnp.transpose(w_dense),
                   ((0, 0), (0, cpad - classes))).astype(jnp.bfloat16)
    bias = (b_ih + b_hh).reshape(1, hidden).astype(jnp.float32)
    bd = jnp.pad(b_dense, (0, cpad - classes)).reshape(1, cpad).astype(
        jnp.float32)

    x2 = jnp.pad(x.reshape(seq_len * batch, input_size),
                 ((0, 0), (0, ipad - input_size))).astype(jnp.bfloat16)

    vmem = pl.BlockSpec(memory_space=pltpu.MemorySpace.VMEM)
    kernel = functools.partial(_rnn_classifier_kernel,
                               seq_len=seq_len, batch=batch)
    out_padded = pl.pallas_call(
        kernel,
        out_shape=jax.ShapeDtypeStruct((batch, cpad), jnp.float32),
        in_specs=[vmem] * 6,
        out_specs=vmem,
        scratch_shapes=[pltpu.VMEM((seq_len * batch, hidden), jnp.float32)],
    )(x2, wih_t, whh_t, bias, wd_t, bd)

    return out_padded[:, :classes]


def _reference_forward(x, w_ih, w_hh, b_ih, b_hh, w_dense, b_dense):
    """Pure-JAX f32 reference mirroring torch semantics."""
    T, B, _ = x.shape
    H = w_hh.shape[0]
    h = jnp.zeros((B, H), jnp.float32)
    for t in range(T):
        h = jnp.maximum(x[t] @ w_ih.T + b_ih + h @ w_hh.T + b_hh, 0.0)
    return h @ w_dense.T + b_dense


if __name__ == "__main__":
    # Small shapes consistent with the module: input_size=28, hidden=128,
    # classes=10; seq_len=8, batch=2.
    seq_len, batch = 8, 2
    input_size, hidden_size, classes = 28, 128, 10

    key = jax.random.PRNGKey(0)
    ks = jax.random.split(key, 7)

    # Deterministic init (PyTorch-style uniform(-1/sqrt(H), 1/sqrt(H))).
    bound = 1.0 / jnp.sqrt(jnp.float32(hidden_size))
    w_ih = jax.random.uniform(ks[0], (hidden_size, input_size),
                              jnp.float32, -bound, bound)
    w_hh = jax.random.uniform(ks[1], (hidden_size, hidden_size),
                              jnp.float32, -bound, bound)
    b_ih = jax.random.uniform(ks[2], (hidden_size,), jnp.float32, -bound, bound)
    b_hh = jax.random.uniform(ks[3], (hidden_size,), jnp.float32, -bound, bound)
    w_dense = jax.random.uniform(ks[4], (classes, hidden_size),
                                 jnp.float32, -bound, bound)
    b_dense = jax.random.uniform(ks[5], (classes,), jnp.float32, -bound, bound)

    x = jax.random.normal(ks[6], (seq_len, batch, input_size), jnp.float32)

    out = rnn_classifier_forward(x, w_ih, w_hh, b_ih, b_hh, w_dense, b_dense,
                                 classes=classes)
    out = jax.block_until_ready(out)

    ref = _reference_forward(x, w_ih, w_hh, b_ih, b_hh, w_dense, b_dense)
    assert out.shape == (batch, classes)
    # bf16 MXU operands with f32 accumulation -> relaxed tolerance vs f32 ref.
    assert jnp.allclose(out, ref, atol=5e-2, rtol=5e-2), "mismatch vs reference"

    print("KERNEL_OK")
</pallas_src>

<mosaic_0001>
module attributes {stable_mosaic.version = 11 : i64} {
  func.func @_rnn_classifier_kernel(%arg0: memref<16x128xbf16, #tpu.memory_space<vmem>>, %arg1: memref<128x128xbf16, #tpu.memory_space<vmem>>, %arg2: memref<128x128xbf16, #tpu.memory_space<vmem>>, %arg3: memref<1x128xf32, #tpu.memory_space<vmem>>, %arg4: memref<128x128xbf16, #tpu.memory_space<vmem>>, %arg5: memref<1x128xf32, #tpu.memory_space<vmem>>, %arg6: memref<2x128xf32, #tpu.memory_space<vmem>>, %arg7: memref<16x128xf32, #tpu.memory_space<vmem>>) attributes {dimension_semantics = [], scalar_prefetch = 0 : i64, scratch_operands = 1 : i64, tpu.core_type = #tpu.core_type<tc>} {
    %c0 = arith.constant 0 : index
    %c0_0 = arith.constant 0 : index
    %0 = vector.load %arg0[%c0, %c0_0] : memref<16x128xbf16, #tpu.memory_space<vmem>>, vector<16x128xbf16>
    %c0_1 = arith.constant 0 : index
    %c0_2 = arith.constant 0 : index
    %1 = vector.load %arg1[%c0_1, %c0_2] : memref<128x128xbf16, #tpu.memory_space<vmem>>, vector<128x128xbf16>
    %cst = arith.constant dense<0.000000e+00> : vector<16x128xf32>
    %2 = tpu.matmul %0, %1, %cst {dimension_numbers = #tpu.dot_dimension_numbers<[1], [0], [0], [1], [0, 0, 1, 1], [], []>} : vector<16x128xbf16>, vector<128x128xbf16>, vector<16x128xf32> -> vector<16x128xf32>
    %c0_3 = arith.constant 0 : index
    %c0_4 = arith.constant 0 : index
    %3 = vector.load %arg3[%c0_3, %c0_4] : memref<1x128xf32, #tpu.memory_space<vmem>>, vector<1x128xf32>
    %4 = vector.broadcast %3 : vector<1x128xf32> to vector<16x128xf32>
    %5 = arith.addf %2, %4 : vector<16x128xf32>
    %c0_5 = arith.constant 0 : index
    %c0_6 = arith.constant 0 : index
    %6 = vector.load %arg7[%c0_5, %c0_6] : memref<16x128xf32, #tpu.memory_space<vmem>>, vector<16x128xf32>
    tpu.vector_store %arg7[%c0_5, %c0_6], %5 {strides = array<i32>} : memref<16x128xf32, #tpu.memory_space<vmem>>, vector<16x128xf32>,
    %c0_7 = arith.constant 0 : index
    %c0_8 = arith.constant 0 : index
    %7 = vector.load %arg2[%c0_7, %c0_8] : memref<128x128xbf16, #tpu.memory_space<vmem>>, vector<128x128xbf16>
    %cst_9 = arith.constant 0.000000e+00 : f32
    %8 = vector.broadcast %cst_9 : f32 to vector<2x128xf32>
    %c0_i32 = arith.constant 0 : i32
    %c2_i32 = arith.constant 2 : i32
    %9 = arith.muli %c0_i32, %c2_i32 : i32
    %10 = tpu.assume_multiple %9, 2 : i32
    %11 = arith.index_cast %10 : i32 to index
    %c0_10 = arith.constant 0 : index
    %12 = vector.load %arg7[%11, %c0_10] : memref<16x128xf32, #tpu.memory_space<vmem>>, vector<2x128xf32>
    %13 = arith.truncf %8 : vector<2x128xf32> to vector<2x128xbf16>
    %cst_11 = arith.constant dense<0.000000e+00> : vector<2x128xf32>
    %14 = tpu.matmul %13, %7, %cst_11 {dimension_numbers = #tpu.dot_dimension_numbers<[1], [0], [0], [1], [0, 0, 1, 1], [], []>} : vector<2x128xbf16>, vector<128x128xbf16>, vector<2x128xf32> -> vector<2x128xf32>
    %15 = arith.addf %12, %14 : vector<2x128xf32>
    %cst_12 = arith.constant 0.000000e+00 : f32
    %16 = vector.broadcast %cst_12 : f32 to vector<2x128xf32>
    %17 = arith.maximumf %15, %16 : vector<2x128xf32>
    %c1_i32 = arith.constant 1 : i32
    %c2_i32_13 = arith.constant 2 : i32
    %18 = arith.muli %c1_i32, %c2_i32_13 : i32
    %19 = tpu.assume_multiple %18, 2 : i32
    %20 = arith.index_cast %19 : i32 to index
    %c0_14 = arith.constant 0 : index
    %21 = vector.load %arg7[%20, %c0_14] : memref<16x128xf32, #tpu.memory_space<vmem>>, vector<2x128xf32>
    %22 = arith.truncf %17 : vector<2x128xf32> to vector<2x128xbf16>
    %cst_15 = arith.constant dense<0.000000e+00> : vector<2x128xf32>
    %23 = tpu.matmul %22, %7, %cst_15 {dimension_numbers = #tpu.dot_dimension_numbers<[1], [0], [0], [1], [0, 0, 1, 1], [], []>} : vector<2x128xbf16>, vector<128x128xbf16>, vector<2x128xf32> -> vector<2x128xf32>
    %24 = arith.addf %21, %23 : vector<2x128xf32>
    %cst_16 = arith.constant 0.000000e+00 : f32
    %25 = vector.broadcast %cst_16 : f32 to vector<2x128xf32>
    %26 = arith.maximumf %24, %25 : vector<2x128xf32>
    %c2_i32_17 = arith.constant 2 : i32
    %c2_i32_18 = arith.constant 2 : i32
    %27 = arith.muli %c2_i32_17, %c2_i32_18 : i32
    %28 = tpu.assume_multiple %27, 2 : i32
    %29 = arith.index_cast %28 : i32 to index
    %c0_19 = arith.constant 0 : index
    %30 = vector.load %arg7[%29, %c0_19] : memref<16x128xf32, #tpu.memory_space<vmem>>, vector<2x128xf32>
    %31 = arith.truncf %26 : vector<2x128xf32> to vector<2x128xbf16>
    %cst_20 = arith.constant dense<0.000000e+00> : vector<2x128xf32>
    %32 = tpu.matmul %31, %7, %cst_20 {dimension_numbers = #tpu.dot_dimension_numbers<[1], [0], [0], [1], [0, 0, 1, 1], [], []>} : vector<2x128xbf16>, vector<128x128xbf16>, vector<2x128xf32> -> vector<2x128xf32>
    %33 = arith.addf %30, %32 : vector<2x128xf32>
    %cst_21 = arith.constant 0.000000e+00 : f32
    %34 = vector.broadcast %cst_21 : f32 to vector<2x128xf32>
    %35 = arith.maximumf %33, %34 : vector<2x128xf32>
    %c3_i32 = arith.constant 3 : i32
    %c2_i32_22 = arith.constant 2 : i32
    %36 = arith.muli %c3_i32, %c2_i32_22 : i32
    %37 = tpu.assume_multiple %36, 2 : i32
    %38 = arith.index_cast %37 : i32 to index
    %c0_23 = arith.constant 0 : index
    %39 = vector.load %arg7[%38, %c0_23] : memref<16x128xf32, #tpu.memory_space<vmem>>, vector<2x128xf32>
    %40 = arith.truncf %35 : vector<2x128xf32> to vector<2x128xbf16>
    %cst_24 = arith.constant dense<0.000000e+00> : vector<2x128xf32>
    %41 = tpu.matmul %40, %7, %cst_24 {dimension_numbers = #tpu.dot_dimension_numbers<[1], [0], [0], [1], [0, 0, 1, 1], [], []>} : vector<2x128xbf16>, vector<128x128xbf16>, vector<2x128xf32> -> vector<2x128xf32>
    %42 = arith.addf %39, %41 : vector<2x128xf32>
    %cst_25 = arith.constant 0.000000e+00 : f32
    %43 = vector.broadcast %cst_25 : f32 to vector<2x128xf32>
    %44 = arith.maximumf %42, %43 : vector<2x128xf32>
    %c4_i32 = arith.constant 4 : i32
    %c2_i32_26 = arith.constant 2 : i32
    %45 = arith.muli %c4_i32, %c2_i32_26 : i32
    %46 = tpu.assume_multiple %45, 2 : i32
    %47 = arith.index_cast %46 : i32 to index
    %c0_27 = arith.constant 0 : index
    %48 = vector.load %arg7[%47, %c0_27] : memref<16x128xf32, #tpu.memory_space<vmem>>, vector<2x128xf32>
    %49 = arith.truncf %44 : vector<2x128xf32> to vector<2x128xbf16>
    %cst_28 = arith.constant dense<0.000000e+00> : vector<2x128xf32>
    %50 = tpu.matmul %49, %7, %cst_28 {dimension_numbers = #tpu.dot_dimension_numbers<[1], [0], [0], [1], [0, 0, 1, 1], [], []>} : vector<2x128xbf16>, vector<128x128xbf16>, vector<2x128xf32> -> vector<2x128xf32>
    %51 = arith.addf %48, %50 : vector<2x128xf32>
    %cst_29 = arith.constant 0.000000e+00 : f32
    %52 = vector.broadcast %cst_29 : f32 to vector<2x128xf32>
    %53 = arith.maximumf %51, %52 : vector<2x128xf32>
    %c5_i32 = arith.constant 5 : i32
    %c2_i32_30 = arith.constant 2 : i32
    %54 = arith.muli %c5_i32, %c2_i32_30 : i32
    %55 = tpu.assume_multiple %54, 2 : i32
    %56 = arith.index_cast %55 : i32 to index
    %c0_31 = arith.constant 0 : index
    %57 = vector.load %arg7[%56, %c0_31] : memref<16x128xf32, #tpu.memory_space<vmem>>, vector<2x128xf32>
    %58 = arith.truncf %53 : vector<2x128xf32> to vector<2x128xbf16>
    %cst_32 = arith.constant dense<0.000000e+00> : vector<2x128xf32>
    %59 = tpu.matmul %58, %7, %cst_32 {dimension_numbers = #tpu.dot_dimension_numbers<[1], [0], [0], [1], [0, 0, 1, 1], [], []>} : vector<2x128xbf16>, vector<128x128xbf16>, vector<2x128xf32> -> vector<2x128xf32>
    %60 = arith.addf %57, %59 : vector<2x128xf32>
    %cst_33 = arith.constant 0.000000e+00 : f32
    %61 = vector.broadcast %cst_33 : f32 to vector<2x128xf32>
    %62 = arith.maximumf %60, %61 : vector<2x128xf32>
    %c6_i32 = arith.constant 6 : i32
    %c2_i32_34 = arith.constant 2 : i32
    %63 = arith.muli %c6_i32, %c2_i32_34 : i32
    %64 = tpu.assume_multiple %63, 2 : i32
    %65 = arith.index_cast %64 : i32 to index
    %c0_35 = arith.constant 0 : index
    %66 = vector.load %arg7[%65, %c0_35] : memref<16x128xf32, #tpu.memory_space<vmem>>, vector<2x128xf32>
    %67 = arith.truncf %62 : vector<2x128xf32> to vector<2x128xbf16>
    %cst_36 = arith.constant dense<0.000000e+00> : vector<2x128xf32>
    %68 = tpu.matmul %67, %7, %cst_36 {dimension_numbers = #tpu.dot_dimension_numbers<[1], [0], [0], [1], [0, 0, 1, 1], [], []>} : vector<2x128xbf16>, vector<128x128xbf16>, vector<2x128xf32> -> vector<2x128xf32>
    %69 = arith.addf %66, %68 : vector<2x128xf32>
    %cst_37 = arith.constant 0.000000e+00 : f32
    %70 = vector.broadcast %cst_37 : f32 to vector<2x128xf32>
    %71 = arith.maximumf %69, %70 : vector<2x128xf32>
    %c7_i32 = arith.constant 7 : i32
    %c2_i32_38 = arith.constant 2 : i32
    %72 = arith.muli %c7_i32, %c2_i32_38 : i32
    %73 = tpu.assume_multiple %72, 2 : i32
    %74 = arith.index_cast %73 : i32 to index
    %c0_39 = arith.constant 0 : index
    %75 = vector.load %arg7[%74, %c0_39] : memref<16x128xf32, #tpu.memory_space<vmem>>, vector<2x128xf32>
    %76 = arith.truncf %71 : vector<2x128xf32> to vector<2x128xbf16>
    %cst_40 = arith.constant dense<0.000000e+00> : vector<2x128xf32>
    %77 = tpu.matmul %76, %7, %cst_40 {dimension_numbers = #tpu.dot_dimension_numbers<[1], [0], [0], [1], [0, 0, 1, 1], [], []>} : vector<2x128xbf16>, vector<128x128xbf16>, vector<2x128xf32> -> vector<2x128xf32>
    %78 = arith.addf %75, %77 : vector<2x128xf32>
    %cst_41 = arith.constant 0.000000e+00 : f32
    %79 = vector.broadcast %cst_41 : f32 to vector<2x128xf32>
    %80 = arith.maximumf %78, %79 : vector<2x128xf32>
    %c8_i32 = arith.constant 8 : i32
    %81 = arith.truncf %80 : vector<2x128xf32> to vector<2x128xbf16>
    %c0_42 = arith.constant 0 : index
    %c0_43 = arith.constant 0 : index
    %82 = vector.load %arg4[%c0_42, %c0_43] : memref<128x128xbf16, #tpu.memory_space<vmem>>, vector<128x128xbf16>
    %cst_44 = arith.constant dense<0.000000e+00> : vector<2x128xf32>
    %83 = tpu.matmul %81, %82, %cst_44 {dimension_numbers = #tpu.dot_dimension_numbers<[1], [0], [0], [1], [0, 0, 1, 1], [], []>} : vector<2x128xbf16>, vector<128x128xbf16>, vector<2x128xf32> -> vector<2x128xf32>
    %c0_45 = arith.constant 0 : index
    %c0_46 = arith.constant 0 : index
    %84 = vector.load %arg5[%c0_45, %c0_46] : memref<1x128xf32, #tpu.memory_space<vmem>>, vector<1x128xf32>
    %85 = vector.broadcast %84 : vector<1x128xf32> to vector<2x128xf32>
    %86 = arith.addf %83, %85 : vector<2x128xf32>
    %c0_47 = arith.constant 0 : index
    %c0_48 = arith.constant 0 : index
    %87 = vector.load %arg6[%c0_47, %c0_48] : memref<2x128xf32, #tpu.memory_space<vmem>>, vector<2x128xf32>
    tpu.vector_store %arg6[%c0_47, %c0_48], %86 {strides = array<i32>} : memref<2x128xf32, #tpu.memory_space<vmem>>, vector<2x128xf32>,
    return
  }
}

</mosaic_0001>

<bundles_post_ra>
// kernel: rnn_classifier_forward.1
= control target key start
LH: loop header
LB: loop body
LE: loop exit
PB: predicated region body
PF: predicated region fallthrough
CT: control target
= control target key end

     0   :  { %s748_s0 = inlined_call_operand.vmem [shape: bf16[16,128], index: 0, kind: input, shape index: {}]   ;;  %s749_s1 = inlined_call_operand.vmem [shape: bf16[128,128], index: 1, kind: input, shape index: {}]   ;;  %s750_s2 = inlined_call_operand.vmem [shape: bf16[128,128], index: 2, kind: input, shape index: {}]   ;;  %s751_s3 = inlined_call_operand.vmem [shape: f32[1,128], index: 3, kind: input, shape index: {}]   ;;  %s752_s4 = inlined_call_operand.vmem [shape: bf16[128,128], index: 4, kind: input, shape index: {}]   ;;  %s753_s5 = inlined_call_operand.vmem [shape: f32[1,128], index: 5, kind: input, shape index: {}]   ;;  %s754_s6 = inlined_call_operand.hbm [shape: f32[2,128], index: 6, kind: output, shape index: {}]  }
   0x1   :  { %v530_v0 = vld [vmem:[%s749_s1 + $0x38] sm:$0xff]  ;;  %v529_v2 = vld [vmem:[%s749_s1 + $0x30] sm:$0xff]  ;;  %v528_v4 = vld [vmem:[%s749_s1 + $0x28] sm:$0xff] }
   0x2   :  { %v620_v1 = vld [vmem:[%s750_s2 + $0x38] sm:$0xff]  ;;  %101 = vmatpush.bf16.msra.mxu0 %v530_v0  ;;  %v629_v3 = vld [vmem:[%s750_s2 + $0x30] sm:$0xff]  ;;  %v640_v5 = vld [vmem:[%s750_s2 + $0x28] sm:$0xff] }
   0x3   :  { %182 = vmatpush.bf16.msra.mxu1 %v620_v1  ;;  %200 = vmatpush.bf16.msra.mxu2 %v620_v1 }
   0x4   :  { %218 = vmatpush.bf16.msra.mxu3 %v620_v1 }
   0x6   :  { %102 = vmatpush.bf16.msra.mxu0 %v529_v2 }
   0x7   :  { %183 = vmatpush.bf16.msra.mxu1 %v629_v3 }
   0x8   :  { %11 = vsyncpa [#allocation4], 0  ;;  %201 = vmatpush.bf16.msra.mxu2 %v629_v3  ;;  %219 = vmatpush.bf16.msra.mxu3 %v629_v3  ;;  %v527_v6 = vld [vmem:[%s749_s1 + $0x20] sm:$0xff]  ;;  %v526_v8 = vld [vmem:[%s749_s1 + $0x18] sm:$0xff]  ;;  %v577_v17 = vmov 0   ;;  %s578_s23 = smov [#allocation3]  }
   0x9   :  { %v651_v7 = vld [vmem:[%s750_s2 + $0x20] sm:$0xff]  ;;  %v662_v9 = vld [vmem:[%s750_s2 + $0x18] sm:$0xff]  ;;  %v525_v10 = vld [vmem:[%s749_s1 + $0x10] sm:$0xff]  ;;  %s411_s24 = sshll.u32 %s578_s23, 4  ;;  %s413_s27 = sshll.u32 %s754_s6, 4  ;;  %s412_s24 = int_to_ptr.vmem [resolvable:$true] %s411_s24  ;;  %s414_s27 = int_to_ptr.hbm [resolvable:$true] %s413_s27 }
   0xa   :  { %103 = vmatpush.bf16.msra.mxu0 %v528_v4  ;;  %v533_v11 = vld [vmem:[%s750_s2 + $0x10] sm:$0xff]  ;;  %v524_v12 = vld [vmem:[%s749_s1 + $0x8] sm:$0xff]  ;;  %v523_v14 = vld [vmem:[%s749_s1] sm:$0xff] }
   0xb   :  { %184 = vmatpush.bf16.msra.mxu1 %v640_v5  ;;  %v532_v13 = vld [vmem:[%s750_s2 + $0x8] sm:$0xff]  ;;  %v531_v15 = vld [vmem:[%s750_s2] sm:$0xff]  ;;  %v546_v59 = vld [vmem:[%s752_s4 + $0x38] sm:$0xff] }
   0xc   :  { %202 = vmatpush.bf16.msra.mxu2 %v640_v5  ;;  %220 = vmatpush.bf16.msra.mxu3 %v640_v5  ;;  %v522_v16 = vld [vmem:[%s748_s0] sm:$0xff]  ;;  %v545_v60 = vld [vmem:[%s752_s4 + $0x30] sm:$0xff]  ;;  %v544_v61 = vld [vmem:[%s752_s4 + $0x28] sm:$0xff] }
   0xd   :  { %v549_v18 = vld [vmem:[%s751_s3] ss:$0 sm:$0xff]  ;;  %v542_v63 = vld [vmem:[%s752_s4 + $0x18] sm:$0xff]  ;;  %v541_v0 = vld [vmem:[%s752_s4 + $0x10] sm:$0xff] }
   0xe   :  { %104 = vmatpush.bf16.msra.mxu0 %v527_v6  ;;  %v543_v62 = vld [vmem:[%s752_s4 + $0x20] sm:$0xff] }
   0xf   :  { %185 = vmatpush.bf16.msra.mxu1 %v651_v7 }
  0x10   :  { %203 = vmatpush.bf16.msra.mxu2 %v651_v7  ;;  %221 = vmatpush.bf16.msra.mxu3 %v651_v7 }
  0x12   :  { %105 = vmatpush.bf16.msra.mxu0 %v526_v8  ;;  %v539_v8 = vld [vmem:[%s752_s4] sm:$0xff] }
  0x13   :  { %186 = vmatpush.bf16.msra.mxu1 %v662_v9 }
  0x14   :  { %204 = vmatpush.bf16.msra.mxu2 %v662_v9  ;;  %222 = vmatpush.bf16.msra.mxu3 %v662_v9 }
  0x16   :  { %106 = vmatpush.bf16.msra.mxu0 %v525_v10 }
  0x17   :  { %187 = vmatpush.bf16.msra.mxu1 %v533_v11 }
  0x18   :  { %205 = vmatpush.bf16.msra.mxu2 %v533_v11  ;;  %223 = vmatpush.bf16.msra.mxu3 %v533_v11 }
  0x1a   :  { %107 = vmatpush.bf16.msra.mxu0 %v524_v12 }
  0x1b   :  { %188 = vmatpush.bf16.msra.mxu1 %v532_v13 }
  0x1c   :  { %206 = vmatpush.bf16.msra.mxu2 %v532_v13  ;;  %224 = vmatpush.bf16.msra.mxu3 %v532_v13 }
  0x1e   :  { %108 = vmatpush.bf16.msra.mxu0 %v523_v14 }
  0x1f   :  { %189 = vmatpush.bf16.msra.mxu1 %v531_v15 }
  0x20   :  { %207 = vmatpush.bf16.msra.mxu2 %v531_v15  ;;  %225 = vmatpush.bf16.msra.mxu3 %v531_v15 }
  0x21   :  { %109 = vmatmul.bf16.vlgmr.msra.gmra.mxu0 %v522_v16 }
  0x22   :  { %236 = vmatpush.bf16.msrb.mxu0 %v620_v1  ;;  %190 = vmatmul.bf16.vlgmr.msra.gmra.mxu1 %v577_v17 }
  0x23   :  { %254 = vmatpush.bf16.msrb.mxu1 %v620_v1 }
  0x24   :  { %272 = vmatpush.bf16.msrb.mxu2 %v620_v1  ;;  %290 = vmatpush.bf16.msrb.mxu3 %v620_v1 }
  0x26   :  { %237 = vmatpush.bf16.msrb.mxu0 %v629_v3 }
  0x27   :  { %255 = vmatpush.bf16.msrb.mxu1 %v629_v3 }
  0x28   :  { %273 = vmatpush.bf16.msrb.mxu2 %v629_v3  ;;  %291 = vmatpush.bf16.msrb.mxu3 %v629_v3 }
  0x2a   :  { %238 = vmatpush.bf16.msrb.mxu0 %v640_v5 }
  0x2b   :  { %256 = vmatpush.bf16.msrb.mxu1 %v640_v5 }
  0x2c   :  { %274 = vmatpush.bf16.msrb.mxu2 %v640_v5  ;;  %292 = vmatpush.bf16.msrb.mxu3 %v640_v5 }
  0x2e   :  { %239 = vmatpush.bf16.msrb.mxu0 %v651_v7 }
  0x2f   :  { %257 = vmatpush.bf16.msrb.mxu1 %v651_v7 }
  0x30   :  { %275 = vmatpush.bf16.msrb.mxu2 %v651_v7  ;;  %293 = vmatpush.bf16.msrb.mxu3 %v651_v7 }
  0x32   :  { %240 = vmatpush.bf16.msrb.mxu0 %v662_v9 }
  0x33   :  { %258 = vmatpush.bf16.msrb.mxu1 %v662_v9 }
  0x34   :  { %276 = vmatpush.bf16.msrb.mxu2 %v662_v9  ;;  %294 = vmatpush.bf16.msrb.mxu3 %v662_v9 }
  0x36   :  { %241 = vmatpush.bf16.msrb.mxu0 %v533_v11 }
  0x37   :  { %259 = vmatpush.bf16.msrb.mxu1 %v533_v11 }
  0x38   :  { %277 = vmatpush.bf16.msrb.mxu2 %v533_v11  ;;  %295 = vmatpush.bf16.msrb.mxu3 %v533_v11 }
  0x3a   :  { %242 = vmatpush.bf16.msrb.mxu0 %v532_v13 }
  0x3b   :  { %260 = vmatpush.bf16.msrb.mxu1 %v532_v13 }
  0x3c   :  { %278 = vmatpush.bf16.msrb.mxu2 %v532_v13  ;;  %296 = vmatpush.bf16.msrb.mxu3 %v532_v13 }
  0x3e   :  { %243 = vmatpush.bf16.msrb.mxu0 %v531_v15 }
  0x3f   :  { %261 = vmatpush.bf16.msrb.mxu1 %v531_v15 }
  0x40   :  { %279 = vmatpush.bf16.msrb.mxu2 %v531_v15  ;;  %297 = vmatpush.bf16.msrb.mxu3 %v531_v15 }
  0x42   :  { %308 = vmatpush.bf16.msra.mxu0 %v620_v1 }
  0x43   :  { %392 = vmatpush.bf16.msra.mxu1 %v546_v59 }
  0x46   :  { %309 = vmatpush.bf16.msra.mxu0 %v629_v3 }
  0x47   :  { %393 = vmatpush.bf16.msra.mxu1 %v545_v60 }
  0x4a   :  { %310 = vmatpush.bf16.msra.mxu0 %v640_v5 }
  0x4b   :  { %394 = vmatpush.bf16.msra.mxu1 %v544_v61 }
  0x4e   :  { %311 = vmatpush.bf16.msra.mxu0 %v651_v7  ;;  %v540_v7 = vld [vmem:[%s752_s4 + $0x8] sm:$0xff] }
  0x4f   :  { %395 = vmatpush.bf16.msra.mxu1 %v543_v62 }
  0x52   :  { %312 = vmatpush.bf16.msra.mxu0 %v662_v9 }
  0x53   :  { %396 = vmatpush.bf16.msra.mxu1 %v542_v63 }
  0x56   :  { %313 = vmatpush.bf16.msra.mxu0 %v533_v11 }
  0x57   :  { %397 = vmatpush.bf16.msra.mxu1 %v541_v0 }
  0x5a   :  { %314 = vmatpush.bf16.msra.mxu0 %v532_v13 }
  0x5b   :  { %398 = vmatpush.bf16.msra.mxu1 %v540_v7 }
  0x5e   :  { %315 = vmatpush.bf16.msra.mxu0 %v531_v15  ;;  %v550_v15 = vld [vmem:[%s753_s5] ss:$0 sm:$0xff] }
  0x5f   :  { %399 = vmatpush.bf16.msra.mxu1 %v539_v8 }
  0x9e   :  { %v110_v19 = vpop.f32.mrf.mxu0 }
  0x9f   :  { %v191_v20 = vpop.f32.mrf.mxu1  ;;  %v111_v21 = vadd.f32 %v549_v18, %v110_v19 }
  0xa1   :  { %115 = vst [vmem:[#allocation2] sm:$0xff] %v111_v21 }
  0xa6   :  { %v112_v22 = vpop.f32.mrf.mxu0 }
  0xa7   :  { %v193_v23 = vpop.f32.mrf.mxu1  ;;  %v113_v24 = vadd.f32 %v549_v18, %v112_v22 }
  0xa8   :  { %v133_v25 = vld [vmem:[#allocation2] sm:$0x3]  ;;  %v198_v29 = vld [vmem:[#allocation2 + $0x2] sm:$0x3]  ;;  %v216_v35 = vld [vmem:[#allocation2 + $0x4] sm:$0x3] }
  0xa9   :  { %v195_v26 = vadd.f32 %v191_v20, %v133_v25  ;;  %116 = vst [vmem:[#allocation2 + $0x8] sm:$0xff] %v113_v24  ;;  %v234_v41 = vld [vmem:[#allocation2 + $0x6] sm:$0x3] }
  0xab   :  { %v196_v27 = vmax.f32 %v195_v26, 0.0 }
  0xad   :  { %v199_v28 = vpack.c.bf16 %v196_v27, %v196_v27 }
  0xaf   :  { %208 = vmatmul.bf16.vlgmr.msra.gmra.mxu2 %v199_v28 }
  0xb0   :  { %v252_v47 = vld [vmem:[#allocation2 + $0x8] sm:$0x3]  ;;  %v270_v53 = vld [vmem:[#allocation2 + $0xa] sm:$0x3]  ;;  %v288_v1 = vld [vmem:[#allocation2 + $0xc] sm:$0x3] }
  0xb1   :  { %v306_v9 = vld [vmem:[#allocation2 + $0xe] sm:$0x3] }
 0x132   :  { %v209_v30 = vpop.f32.mrf.mxu2 }
 0x133   :  { %v213_v31 = vadd.f32 %v209_v30, %v198_v29 }
 0x135   :  { %v214_v32 = vmax.f32 %v213_v31, 0.0 }
 0x137   :  { %v217_v33 = vpack.c.bf16 %v214_v32, %v214_v32 }
 0x139   :  { %226 = vmatmul.bf16.vlgmr.msra.gmra.mxu3 %v217_v33 }
 0x13a   :  { %v211_v34 = vpop.f32.mrf.mxu2 }
 0x1bc   :  { %v227_v36 = vpop.f32.mrf.mxu3 }
 0x1bd   :  { %v231_v37 = vadd.f32 %v227_v36, %v216_v35 }
 0x1bf   :  { %v232_v38 = vmax.f32 %v231_v37, 0.0 }
 0x1c1   :  { %v235_v39 = vpack.c.bf16 %v232_v38, %v232_v38 }
 0x1c3   :  { %244 = vmatmul.bf16.vlgmr.msrb.gmra.mxu0 %v235_v39 }
 0x1c4   :  { %v229_v40 = vpop.f32.mrf.mxu3 }
 0x240   :  { %v245_v42 = vpop.f32.mrf.mxu0 }
 0x241   :  { %v249_v43 = vadd.f32 %v245_v42, %v234_v41 }
 0x243   :  { %v250_v44 = vmax.f32 %v249_v43, 0.0 }
 0x245   :  { %v253_v45 = vpack.c.bf16 %v250_v44, %v250_v44 }
 0x247   :  { %262 = vmatmul.bf16.vlgmr.msrb.gmra.mxu1 %v253_v45 }
 0x248   :  { %v247_v46 = vpop.f32.mrf.mxu0 }
 0x2c4   :  { %v263_v48 = vpop.f32.mrf.mxu1 }
 0x2c5   :  { %v267_v49 = vadd.f32 %v263_v48, %v252_v47 }
 0x2c7   :  { %v268_v50 = vmax.f32 %v267_v49, 0.0 }
 0x2c9   :  { %v271_v51 = vpack.c.bf16 %v268_v50, %v268_v50 }
 0x2cb   :  { %280 = vmatmul.bf16.vlgmr.msrb.gmra.mxu2 %v271_v51 }
 0x2cc   :  { %v265_v52 = vpop.f32.mrf.mxu1 }
 0x34e   :  { %v281_v54 = vpop.f32.mrf.mxu2 }
 0x34f   :  { %v285_v55 = vadd.f32 %v281_v54, %v270_v53 }
 0x351   :  { %v286_v56 = vmax.f32 %v285_v55, 0.0 }
 0x353   :  { %v289_v57 = vpack.c.bf16 %v286_v56, %v286_v56 }
 0x355   :  { %298 = vmatmul.bf16.vlgmr.msrb.gmra.mxu3 %v289_v57 }
 0x356   :  { %v283_v58 = vpop.f32.mrf.mxu2 }
 0x3d8   :  { %v299_v2 = vpop.f32.mrf.mxu3 }
 0x3d9   :  { %v303_v3 = vadd.f32 %v299_v2, %v288_v1 }
 0x3db   :  { %v304_v4 = vmax.f32 %v303_v3, 0.0 }
 0x3dd   :  { %v307_v5 = vpack.c.bf16 %v304_v4, %v304_v4 }
 0x3df   :  { %316 = vmatmul.bf16.vlgmr.msra.gmra.mxu0 %v307_v5 }
 0x3e0   :  { %v301_v6 = vpop.f32.mrf.mxu3 }
 0x45c   :  { %v317_v10 = vpop.f32.mrf.mxu0 }
 0x45d   :  { %v321_v11 = vadd.f32 %v317_v10, %v306_v9 }
 0x45f   :  { %v322_v12 = vmax.f32 %v321_v11, 0.0 }
 0x461   :  { %v323_v13 = vpack.c.bf16 %v322_v12, %v322_v12 }
 0x463   :  { %400 = vmatmul.bf16.vlgmr.msra.gmra.mxu1 %v323_v13 }
 0x464   :  { %v319_v14 = vpop.f32.mrf.mxu0 }
 0x4e0   :  { %v401_v16 = vpop.f32.mrf.mxu1 }
 0x4e1   :  { %v402_v17 = vadd.f32 %v550_v15, %v401_v16 }
 0x4e3   :  { %405 = vst [vmem:[#allocation3] sm:$0x3] %v402_v17 }
 0x4e4   :  { %416 = dma.vmem_to_hbm [thread:$0]  %s412_s24, 32, %s414_s27, [#allocation4]  }
 0x4e8   :  { %v403_v18 = vpop.f32.mrf.mxu1 }
 0x4e9   :  { %575 = dma.done.wait [#allocation4], 32  }
 0x4ea   :  { %576 = vsyncadd [#allocation4], 4294967264 }
 0x4eb   :  { %421 = vsyncpa [#allocation4], 1 }

</bundles_post_ra>
